<compile_context>
chip_gen: v7x
topology: tpu7x:2x2x1
jax: 0.10.0
libtpu: 0.0.40
codegen_flags: <defaults>
</compile_context>

<pallas_src>
import functools

import jax
import jax.numpy as jnp
from jax.experimental import pallas as pl
from jax.experimental.pallas import tpu as pltpu


LANES = 128
NUM_LAYERS = 6                       # enc1, enc2, fused-head, dec0(dup), dec_mid, out
SLAB_ROWS = NUM_LAYERS * LANES       # 768 (each layer = one 128x128 block, bias in row 127)
CONST_LANE = 127                     # lane carrying the constant 1.0 (bias path)


def vae_kernel(x_ref, slab_ref, out_ref):
    """x_ref: [TB,128] f32 (x | eps | 0 | 1);  slab_ref: [768,128] bf16;  out_ref: [TB,128] f32."""
    x = x_ref[...]                                   # f32, kept for the reparam multiply
    xb = x.astype(jnp.bfloat16)

    def dense(h_bf16, layer):
        # One 128-row, 16-aligned weight block per layer; bias lives in row 127
        # and is applied via the constant-1 lane of the activation.
        w = slab_ref[layer * LANES:(layer + 1) * LANES, :]      # [128,128] bf16
        return jnp.dot(h_bf16, w, preferred_element_type=jnp.float32)

    # ---- encode ----
    h1 = jnp.maximum(dense(xb, 0), 0.0)              # lanes 0:20 useful, lane 127 == 1
    h2 = jnp.maximum(dense(h1.astype(jnp.bfloat16), 1), 0.0)     # lanes 0:10, lane 127 == 1
    y = dense(h2.astype(jnp.bfloat16), 2)            # mu@0:2, logvar@2:4 and @100:102, lane127==0

    # ---- reparameterize ----
    # eps sits in x lanes 100:102, logvar (duplicated) in y lanes 100:102, so
    # v = [mu | . | eps*std | . | 1];  dec0's weight rows are placed at 0:2 and
    # 100:102 (and are zero elsewhere), hence  v @ Wd0' == (mu + eps*std) @ Wd0.
    # Note: exp(0.5*y) is evaluated on all lanes (y is 0 on unused lanes -> exp = 1).
    lane = jax.lax.broadcasted_iota(jnp.int32, y.shape, 1)
    v = jnp.where(lane < 2, y, x * jnp.exp(0.5 * y))

    # ---- decode ----
    h3 = jnp.maximum(dense(v.astype(jnp.bfloat16), 3), 0.0)
    h4 = jnp.maximum(dense(h3.astype(jnp.bfloat16), 4), 0.0)
    recon = jax.nn.sigmoid(dense(h4.astype(jnp.bfloat16), 5))    # lanes 4:104 useful

    # Single merged output: mu | logvar | recon | (discarded 0.5 padding).
    out_ref[...] = jnp.where(lane < 4, y, recon)


def make_params(key):
    """Deterministic nn.Linear-style init: U(-1/sqrt(fan_in), 1/sqrt(fan_in)).
    Weights stored as [in, out]; biases as [1, out]."""
    dims = [(100, 20), (20, 10), (10, 2), (10, 2), (2, 10), (10, 20), (20, 100)]
    params = []
    for (fan_in, fan_out) in dims:
        key, kw, kb = jax.random.split(key, 3)
        bound = 1.0 / jnp.sqrt(float(fan_in))
        w = jax.random.uniform(kw, (fan_in, fan_out), jnp.float32, -bound, bound)
        b = jax.random.uniform(kb, (1, fan_out), jnp.float32, -bound, bound)
        params.append((w, b))
    return params


def pack_params(params):
    """Pack the 7 PyTorch layers into one [768,128] bf16 slab (call once, reuse)."""
    (w1, b1), (w2, b2), (wmu, bmu), (wlv, blv), (wd0, bd0), (wdm, bdm), (wo, bo) = params
    C = CONST_LANE

    def zeros():
        return jnp.zeros((LANES, LANES), jnp.float32)

    # Block 0: input_linear (100 -> 20), bias in row 127, constant propagated.
    blk0 = zeros().at[:100, :20].set(w1).at[C, :20].set(b1[0]).at[C, C].set(1.0)
    # Block 1: enc_middle (20 -> 10).
    blk1 = zeros().at[:20, :10].set(w2).at[C, :10].set(b2[0]).at[C, C].set(1.0)
    # Block 2: fused mu|logvar head; logvar duplicated at cols 100:102 so it
    # lines up with the eps lanes.  [127,127] stays 0 -> y[:,127]==0 -> exp==1
    # keeps the constant lane equal to 1 inside v.
    blk2 = (zeros()
            .at[:10, 0:2].set(wmu).at[:10, 2:4].set(wlv).at[:10, 100:102].set(wlv)
            .at[C, 0:2].set(bmu[0]).at[C, 2:4].set(blv[0]).at[C, 100:102].set(blv[0]))
    # Block 3: dec_0 (2 -> 10), weight rows duplicated at 0:2 (mu) and 100:102 (eps*std).
    blk3 = (zeros()
            .at[0:2, :10].set(wd0).at[100:102, :10].set(wd0)
            .at[C, :10].set(bd0[0]).at[C, C].set(1.0))
    # Block 4: dec_middle (10 -> 20).
    blk4 = zeros().at[:10, :20].set(wdm).at[C, :20].set(bdm[0]).at[C, C].set(1.0)
    # Block 5: output_linear (20 -> 100), shifted to cols 4:104 so the merged
    # output stays lane-dense (mu|logvar occupy lanes 0:4).
    blk5 = zeros().at[:20, 4:104].set(wo).at[C, 4:104].set(bo[0])

    slab = jnp.concatenate([blk0, blk1, blk2, blk3, blk4, blk5], axis=0)   # [768,128]
    return slab.astype(jnp.bfloat16)


def _round_up(n, m):
    return ((n + m - 1) // m) * m


def _tile_plan(B, max_tile):
    """Pick (tile rows, padded batch, num grid steps): big tiles, >=2 steps when
    possible (v7x has 2 TensorCores), minimal padding waste."""
    B8 = _round_up(max(B, 1), 8)
    n_steps = max(pl.cdiv(B8, max_tile), 2 if B8 >= 16 else 1)
    TB = _round_up(pl.cdiv(B8, n_steps), 8)
    return TB, TB * n_steps, n_steps


@functools.partial(jax.jit, static_argnames=("max_tile",))
def vae_forward(x, eps, slab, *, max_tile=1024):
    """x: [B,100], eps: [B,2], slab: packed weights -> (recon [B,100], mu [B,2], logvar [B,2])."""
    B = x.shape[0]
    TB, B_pad, n_steps = _tile_plan(B, max_tile)

    # Single lane-dense input slab: x | eps | zeros | constant 1.0.
    xin = jnp.zeros((B_pad, LANES), jnp.float32)
    xin = xin.at[:, CONST_LANE].set(1.0)
    xin = xin.at[:B, :100].set(x)
    xin = xin.at[:B, 100:102].set(eps)

    out = pl.pallas_call(
        vae_kernel,
        out_shape=jax.ShapeDtypeStruct((B_pad, LANES), jnp.float32),
        grid=(n_steps,),
        in_specs=[
            pl.BlockSpec((TB, LANES), lambda i: (i, 0)),          # x|eps slab
            pl.BlockSpec((SLAB_ROWS, LANES), lambda i: (0, 0)),   # weights (VMEM-resident)
        ],
        out_specs=pl.BlockSpec((TB, LANES), lambda i: (i, 0)),
        compiler_params=pltpu.CompilerParams(
            dimension_semantics=("parallel",)),
    )(xin, slab)

    mu = out[:B, 0:2]
    logvar = out[:B, 2:4]
    recon = out[:B, 4:104]
    return recon, mu, logvar


if __name__ == "__main__":
    key = jax.random.PRNGKey(0)
    kp, kx, ke = jax.random.split(key, 3)

    params = make_params(kp)
    slab = pack_params(params)   # packed once, reused across calls

    B = 8
    # Input equivalent to something that x.view(-1, 100) flattens to [B, 100].
    x = jax.random.normal(kx, (B, 100), dtype=jnp.float32)
    # eps ~ randn_like(std): drawn host-side and packed into the input slab.
    # TODO(synk): could alternatively be drawn in-kernel via pltpu.prng_seed/prng_random_bits.
    eps = jax.random.normal(ke, (B, 2), dtype=jnp.float32)

    recon, mu, logvar = vae_forward(x, eps, slab)
    jax.block_until_ready((recon, mu, logvar))

    # Pure-JAX f32 reference of the same forward math (kernel uses bf16 matmul
    # operands with f32 accumulation, so tolerance is relaxed accordingly).
    def ref_forward(x, eps, params):
        (w1, b1), (w2, b2), (wmu, bmu), (wlv, blv), (wd0, bd0), (wdm, bdm), (wo, bo) = params
        h1 = jnp.maximum(x @ w1 + b1, 0.0)
        h2 = jnp.maximum(h1 @ w2 + b2, 0.0)
        mu_ = h2 @ wmu + bmu
        lv_ = h2 @ wlv + blv
        z = eps * jnp.exp(0.5 * lv_) + mu_
        h3 = jnp.maximum(z @ wd0 + bd0, 0.0)
        h4 = jnp.maximum(h3 @ wdm + bdm, 0.0)
        return jax.nn.sigmoid(h4 @ wo + bo), mu_, lv_

    r_ref, mu_ref_, lv_ref_ = ref_forward(x, eps, params)
    assert jnp.allclose(recon, r_ref, atol=5e-2), "recon mismatch"
    assert jnp.allclose(mu, mu_ref_, atol=5e-2), "mu mismatch"
    assert jnp.allclose(logvar, lv_ref_, atol=5e-2), "logvar mismatch"

    print("KERNEL_OK")
</pallas_src>

<mosaic_0001>
module attributes {stable_mosaic.version = 11 : i64} {
  func.func @vae_kernel(%arg0: i32, %arg1: memref<8x128xf32, #tpu.memory_space<vmem>>, %arg2: memref<768x128xbf16, #tpu.memory_space<vmem>>, %arg3: memref<8x128xf32, #tpu.memory_space<vmem>>) attributes {dimension_semantics = [#tpu.dimension_semantics<parallel>], iteration_bounds = array<i64: 1>, scalar_prefetch = 0 : i64, scratch_operands = 0 : i64, tpu.core_type = #tpu.core_type<tc>, window_params = [{transform_indices = @transform_0, window_bounds = array<i64: 8, 128>}, {pipeline_mode = #tpu.pipeline_mode<synchronous>, transform_indices = @transform_1, window_bounds = array<i64: 768, 128>}, {transform_indices = @transform_2, window_bounds = array<i64: 8, 128>}]} {
    %c0 = arith.constant 0 : index
    %c0_0 = arith.constant 0 : index
    %0 = vector.load %arg1[%c0, %c0_0] : memref<8x128xf32, #tpu.memory_space<vmem>>, vector<8x128xf32>
    %1 = arith.truncf %0 : vector<8x128xf32> to vector<8x128xbf16>
    %c0_1 = arith.constant 0 : index
    %c0_2 = arith.constant 0 : index
    %2 = vector.load %arg2[%c0_1, %c0_2] : memref<768x128xbf16, #tpu.memory_space<vmem>>, vector<128x128xbf16>
    %cst = arith.constant dense<0.000000e+00> : vector<8x128xf32>
    %3 = tpu.matmul %1, %2, %cst {dimension_numbers = #tpu.dot_dimension_numbers<[1], [0], [0], [1], [0, 0, 1, 1], [], []>} : vector<8x128xbf16>, vector<128x128xbf16>, vector<8x128xf32> -> vector<8x128xf32>
    %cst_3 = arith.constant 0.000000e+00 : f32
    %4 = vector.broadcast %cst_3 : f32 to vector<8x128xf32>
    %5 = arith.maximumf %3, %4 : vector<8x128xf32>
    %6 = arith.truncf %5 : vector<8x128xf32> to vector<8x128xbf16>
    %c128 = arith.constant 128 : index
    %c0_4 = arith.constant 0 : index
    %7 = vector.load %arg2[%c128, %c0_4] : memref<768x128xbf16, #tpu.memory_space<vmem>>, vector<128x128xbf16>
    %cst_5 = arith.constant dense<0.000000e+00> : vector<8x128xf32>
    %8 = tpu.matmul %6, %7, %cst_5 {dimension_numbers = #tpu.dot_dimension_numbers<[1], [0], [0], [1], [0, 0, 1, 1], [], []>} : vector<8x128xbf16>, vector<128x128xbf16>, vector<8x128xf32> -> vector<8x128xf32>
    %cst_6 = arith.constant 0.000000e+00 : f32
    %9 = vector.broadcast %cst_6 : f32 to vector<8x128xf32>
    %10 = arith.maximumf %8, %9 : vector<8x128xf32>
    %11 = arith.truncf %10 : vector<8x128xf32> to vector<8x128xbf16>
    %c256 = arith.constant 256 : index
    %c0_7 = arith.constant 0 : index
    %12 = vector.load %arg2[%c256, %c0_7] : memref<768x128xbf16, #tpu.memory_space<vmem>>, vector<128x128xbf16>
    %cst_8 = arith.constant dense<0.000000e+00> : vector<8x128xf32>
    %13 = tpu.matmul %11, %12, %cst_8 {dimension_numbers = #tpu.dot_dimension_numbers<[1], [0], [0], [1], [0, 0, 1, 1], [], []>} : vector<8x128xbf16>, vector<128x128xbf16>, vector<8x128xf32> -> vector<8x128xf32>
    %14 = tpu.iota {dimensions = array<i32: 1>} : vector<8x128xi32>
    %c2_i32 = arith.constant 2 : i32
    %15 = vector.broadcast %c2_i32 : i32 to vector<8x128xi32>
    %16 = arith.cmpi slt, %14, %15 : vector<8x128xi32>
    %cst_9 = arith.constant 5.000000e-01 : f32
    %17 = vector.broadcast %cst_9 : f32 to vector<8x128xf32>
    %18 = arith.mulf %17, %13 : vector<8x128xf32>
    %19 = math.exp %18 : vector<8x128xf32>
    %20 = arith.mulf %0, %19 : vector<8x128xf32>
    %21 = arith.select %16, %13, %20 : vector<8x128xi1>, vector<8x128xf32>
    %22 = arith.truncf %21 : vector<8x128xf32> to vector<8x128xbf16>
    %c384 = arith.constant 384 : index
    %c0_10 = arith.constant 0 : index
    %23 = vector.load %arg2[%c384, %c0_10] : memref<768x128xbf16, #tpu.memory_space<vmem>>, vector<128x128xbf16>
    %cst_11 = arith.constant dense<0.000000e+00> : vector<8x128xf32>
    %24 = tpu.matmul %22, %23, %cst_11 {dimension_numbers = #tpu.dot_dimension_numbers<[1], [0], [0], [1], [0, 0, 1, 1], [], []>} : vector<8x128xbf16>, vector<128x128xbf16>, vector<8x128xf32> -> vector<8x128xf32>
    %cst_12 = arith.constant 0.000000e+00 : f32
    %25 = vector.broadcast %cst_12 : f32 to vector<8x128xf32>
    %26 = arith.maximumf %24, %25 : vector<8x128xf32>
    %27 = arith.truncf %26 : vector<8x128xf32> to vector<8x128xbf16>
    %c512 = arith.constant 512 : index
    %c0_13 = arith.constant 0 : index
    %28 = vector.load %arg2[%c512, %c0_13] : memref<768x128xbf16, #tpu.memory_space<vmem>>, vector<128x128xbf16>
    %cst_14 = arith.constant dense<0.000000e+00> : vector<8x128xf32>
    %29 = tpu.matmul %27, %28, %cst_14 {dimension_numbers = #tpu.dot_dimension_numbers<[1], [0], [0], [1], [0, 0, 1, 1], [], []>} : vector<8x128xbf16>, vector<128x128xbf16>, vector<8x128xf32> -> vector<8x128xf32>
    %cst_15 = arith.constant 0.000000e+00 : f32
    %30 = vector.broadcast %cst_15 : f32 to vector<8x128xf32>
    %31 = arith.maximumf %29, %30 : vector<8x128xf32>
    %32 = arith.truncf %31 : vector<8x128xf32> to vector<8x128xbf16>
    %c640 = arith.constant 640 : index
    %c0_16 = arith.constant 0 : index
    %33 = vector.load %arg2[%c640, %c0_16] : memref<768x128xbf16, #tpu.memory_space<vmem>>, vector<128x128xbf16>
    %cst_17 = arith.constant dense<0.000000e+00> : vector<8x128xf32>
    %34 = tpu.matmul %32, %33, %cst_17 {dimension_numbers = #tpu.dot_dimension_numbers<[1], [0], [0], [1], [0, 0, 1, 1], [], []>} : vector<8x128xbf16>, vector<128x128xbf16>, vector<8x128xf32> -> vector<8x128xf32>
    %35 = arith.negf %34 : vector<8x128xf32>
    %36 = math.exp %35 : vector<8x128xf32>
    %cst_18 = arith.constant 1.000000e+00 : f32
    %37 = vector.broadcast %cst_18 : f32 to vector<8x128xf32>
    %38 = arith.addf %37, %36 : vector<8x128xf32>
    %39 = arith.divf %37, %38 : vector<8x128xf32>
    %c4_i32 = arith.constant 4 : i32
    %40 = vector.broadcast %c4_i32 : i32 to vector<8x128xi32>
    %41 = arith.cmpi slt, %14, %40 : vector<8x128xi32>
    %42 = arith.select %41, %13, %39 : vector<8x128xi1>, vector<8x128xf32>
    %c0_19 = arith.constant 0 : index
    %c0_20 = arith.constant 0 : index
    %43 = vector.load %arg3[%c0_19, %c0_20] : memref<8x128xf32, #tpu.memory_space<vmem>>, vector<8x128xf32>
    tpu.vector_store %arg3[%c0_19, %c0_20], %42 {strides = array<i32>} : memref<8x128xf32, #tpu.memory_space<vmem>>, vector<8x128xf32>,
    return
  }
  func.func @transform_0(%arg0: i32) -> (i32, i32) {
    %c0_i32 = arith.constant 0 : i32
    %c0_i32_0 = arith.constant 0 : i32
    return %arg0, %c0_i32 : i32, i32
  }
  func.func @transform_1(%arg0: i32) -> (i32, i32) {
    %c0_i32 = arith.constant 0 : i32
    %c0_i32_0 = arith.constant 0 : i32
    %c0_i32_1 = arith.constant 0 : i32
    return %c0_i32, %c0_i32_0 : i32, i32
  }
  func.func @transform_2(%arg0: i32) -> (i32, i32) {
    %c0_i32 = arith.constant 0 : i32
    %c0_i32_0 = arith.constant 0 : i32
    return %arg0, %c0_i32 : i32, i32
  }
}

</mosaic_0001>

<bundles_post_ra>
// kernel: vae_forward.1
= control target key start
LH: loop header
LB: loop body
LE: loop exit
PB: predicated region body
PF: predicated region fallthrough
CT: control target
= control target key end

     0   :  { %7 = vsyncpa [#allocation3], 0  ;;  %s989_s9 = smov [#allocation2]   ;;  %s1097_s0 = inlined_call_operand.vmem [shape: f32[8,128], index: 0, kind: input, shape index: {}]   ;;  %s1098_s1 = inlined_call_operand.hbm [shape: bf16[768,128], index: 1, kind: input, shape index: {}]   ;;  %s1099_s2 = inlined_call_operand.vmem [shape: f32[8,128], index: 2, kind: output, shape index: {}]  }
   0x1   :  { %s15_s10 = sshll.u32 %s989_s9, 4  ;;  %s965_s13 = scalar_lea.hbm %s1098_s1, 6144  ;;  %s16_s10 = int_to_ptr.vmem [resolvable:$true] %s15_s10 }
   0x2   :  { %p966_p0 = scmp.ne.s32.totalorder %s1098_s1, %s965_s13  ;;  %p969_p1 = scmp.lt.u32.totalorder %s965_s13, %s1098_s1 }
   0x4   :  { %p971_p2 = pnand %p969_p1, %p966_p0 }
   0x6   :  { %974 = shalt.err (!%p971_p2)
}
   0x7   :  { %s975_s18 = scalar_lea.vmem %s16_s10, 6144  ;;  %p980_p4 = scmp.lt.s32.totalorder %s16_s10, %s16_s10 }
   0x8   :  { %p976_p3 = scmp.ne.s32.totalorder %s16_s10, %s975_s18  ;;  %p981_p5 = scmp.lt.s32.totalorder %s975_s18, %s975_s18 }
   0xa   :  { %p982_p6 = por %p981_p5, %p980_p4 }
   0xc   :  { %p983_p7 = pnand %p982_p6, %p976_p3 }
   0xe   :  { %986 = shalt.err (!%p983_p7)
}
   0xf   :  { %s990_s19 = smov 64   ;;  %s991_s20 = smov 4  }
  0x10   :  { %21 = dma.hbm_to_vmem [thread:$0]  %s1098_s1, 6144, %s16_s10, [#allocation3], %s990_s19, %s990_s19, %s991_s20  }
  0x11   :  { %987 = dma.done.wait [#allocation3], 6144  }
  0x12   :  { %988 = vsyncadd [#allocation3], 4294961152  ;;  %v992_v0 = vmov 0.0   ;;  %vm993_vm0 = vmmov 0   ;;  %v911_v1 = vld [vmem:[#allocation2] sm:$0xff]   ;;  %v912_v2 = vld [vmem:[#allocation2 + $0x8] sm:$0xff]   ;;  %v344_v60 = vlaneseq }
  0x13   :  { %786 = vmatprep.subr.bf16.mxu0 %v992_v0  ;;  %802 = vmatprep.mubr.msk.bf16.mxu0 %vm993_vm0, %v992_v0  ;;  %v913_v3 = vld [vmem:[#allocation2 + $0x10] sm:$0xff]   ;;  %v919_v4 = vld [vmem:[#allocation2 + $0x40] sm:$0xff]   ;;  %v914_v5 = vld [vmem:[#allocation2 + $0x18] sm:$0xff]  }
  0x14   :  { %806 = vmatprep.subr.bf16.mxu1 %v992_v0  ;;  %822 = vmatprep.mubr.msk.bf16.mxu1 %vm993_vm0, %v992_v0  ;;  %v920_v6 = vld [vmem:[#allocation2 + $0x48] sm:$0xff]   ;;  %v915_v7 = vld [vmem:[#allocation2 + $0x20] sm:$0xff]   ;;  %v921_v8 = vld [vmem:[#allocation2 + $0x50] sm:$0xff]   ;;  %v345_v61 = vand.u32 127, %v344_v60 }
  0x15   :  { %787 = vmatpush3.bf16.msra.mxu0 %v911_v1  ;;  %807 = vmatpush3.bf16.msra.mxu1 %v919_v4  ;;  %v916_v9 = vld [vmem:[#allocation2 + $0x28] sm:$0xff]   ;;  %v922_v10 = vld [vmem:[#allocation2 + $0x58] sm:$0xff]   ;;  %v917_v11 = vld [vmem:[#allocation2 + $0x30] sm:$0xff]  }
  0x16   :  { %788 = vmatprep.subr.bf16.mxu0 %v992_v0  ;;  %808 = vmatprep.subr.bf16.mxu1 %v992_v0  ;;  %v923_v12 = vld [vmem:[#allocation2 + $0x60] sm:$0xff]   ;;  %v918_v13 = vld [vmem:[#allocation2 + $0x38] sm:$0xff]   ;;  %v924_v15 = vld [vmem:[#allocation2 + $0x68] sm:$0xff]   ;;  %vm346_vm1 = vcmp.lt.s32.totalorder %v345_v61, 2  ;;  %vm675_vm2 = vcmp.lt.s32.totalorder %v345_v61, 4 }
  0x17   :  { %v1039_v14 = vld [vmem:[%s1097_s0] sm:$0xff]  ;;  %v925_v17 = vld [vmem:[#allocation2 + $0x70] sm:$0xff]   ;;  %v926_v18 = vld [vmem:[#allocation2 + $0x78] sm:$0xff]  }
  0x18   :  { %v27_v16 = vpack.c.bf16 %v1039_v14, %v1039_v14  ;;  %v927_v19 = vld [vmem:[#allocation2 + $0x80] sm:$0xff]   ;;  %v928_v20 = vld [vmem:[#allocation2 + $0x88] sm:$0xff]   ;;  %v929_v21 = vld [vmem:[#allocation2 + $0x90] sm:$0xff]  }
  0x19   :  { %789 = vmatpush3.bf16.msra.mxu0 %v912_v2  ;;  %809 = vmatpush3.bf16.msra.mxu1 %v920_v6  ;;  %v930_v22 = vld [vmem:[#allocation2 + $0x98] sm:$0xff]   ;;  %v931_v23 = vld [vmem:[#allocation2 + $0xa0] sm:$0xff]   ;;  %v932_v24 = vld [vmem:[#allocation2 + $0xa8] sm:$0xff]  }
  0x1a   :  { %790 = vmatprep.subr.bf16.mxu0 %v992_v0  ;;  %810 = vmatprep.subr.bf16.mxu1 %v992_v0  ;;  %v933_v25 = vld [vmem:[#allocation2 + $0xb0] sm:$0xff]   ;;  %v934_v32 = vld [vmem:[#allocation2 + $0xb8] sm:$0xff]   ;;  %v935_v33 = vld [vmem:[#allocation2 + $0xc0] sm:$0xff]  }
  0x1b   :  { %v936_v34 = vld [vmem:[#allocation2 + $0xc8] sm:$0xff]   ;;  %v937_v35 = vld [vmem:[#allocation2 + $0xd0] sm:$0xff]   ;;  %v938_v42 = vld [vmem:[#allocation2 + $0xd8] sm:$0xff]  }
  0x1c   :  { %v939_v43 = vld [vmem:[#allocation2 + $0xe0] sm:$0xff]   ;;  %v940_v44 = vld [vmem:[#allocation2 + $0xe8] sm:$0xff]   ;;  %v941_v45 = vld [vmem:[#allocation2 + $0xf0] sm:$0xff]  }
  0x1d   :  { %791 = vmatpush3.bf16.msra.mxu0 %v913_v3  ;;  %811 = vmatpush3.bf16.msra.mxu1 %v921_v8  ;;  %v942_v46 = vld [vmem:[#allocation2 + $0xf8] sm:$0xff]   ;;  %v943_v47 = vld [vmem:[#allocation2 + $0x100] sm:$0xff]   ;;  %v944_v48 = vld [vmem:[#allocation2 + $0x108] sm:$0xff]  }
  0x1e   :  { %792 = vmatprep.subr.bf16.mxu0 %v992_v0  ;;  %812 = vmatprep.subr.bf16.mxu1 %v992_v0  ;;  %v945_v49 = vld [vmem:[#allocation2 + $0x110] sm:$0xff]   ;;  %v946_v50 = vld [vmem:[#allocation2 + $0x118] sm:$0xff]   ;;  %v947_v51 = vld [vmem:[#allocation2 + $0x120] sm:$0xff]  }
  0x1f   :  { %v948_v52 = vld [vmem:[#allocation2 + $0x128] sm:$0xff]   ;;  %v949_v53 = vld [vmem:[#allocation2 + $0x130] sm:$0xff]   ;;  %v950_v3 = vld [vmem:[#allocation2 + $0x138] sm:$0xff]  }
  0x20   :  { %v951_v4 = vld [vmem:[#allocation2 + $0x140] sm:$0xff]   ;;  %v953_v6 = vld [vmem:[#allocation2 + $0x150] sm:$0xff]  }
  0x21   :  { %793 = vmatpush3.bf16.msra.mxu0 %v914_v5  ;;  %813 = vmatpush3.bf16.msra.mxu1 %v922_v10  ;;  %v952_v5 = vld [vmem:[#allocation2 + $0x148] sm:$0xff]   ;;  %v955_v8 = vld [vmem:[#allocation2 + $0x160] sm:$0xff]   ;;  %v957_v10 = vld [vmem:[#allocation2 + $0x170] sm:$0xff]  }
  0x22   :  { %794 = vmatprep.subr.bf16.mxu0 %v992_v0  ;;  %814 = vmatprep.subr.bf16.mxu1 %v992_v0 }
  0x25   :  { %795 = vmatpush3.bf16.msra.mxu0 %v915_v7  ;;  %815 = vmatpush3.bf16.msra.mxu1 %v923_v12  ;;  %v954_v7 = vld [vmem:[#allocation2 + $0x158] sm:$0xff]  }
  0x26   :  { %796 = vmatprep.subr.bf16.mxu0 %v992_v0  ;;  %816 = vmatprep.subr.bf16.mxu1 %v992_v0 }
  0x29   :  { %797 = vmatpush3.bf16.msra.mxu0 %v916_v9  ;;  %817 = vmatpush3.bf16.msra.mxu1 %v924_v15  ;;  %v956_v9 = vld [vmem:[#allocation2 + $0x168] sm:$0xff]  }
  0x2a   :  { %798 = vmatprep.subr.bf16.mxu0 %v992_v0  ;;  %818 = vmatprep.subr.bf16.mxu1 %v992_v0 }
  0x2d   :  { %799 = vmatpush3.bf16.msra.mxu0 %v917_v11  ;;  %819 = vmatpush3.bf16.msra.mxu1 %v925_v17  ;;  %v958_v17 = vld [vmem:[#allocation2 + $0x178] sm:$0xff]  }
  0x2e   :  { %800 = vmatprep.subr.bf16.mxu0 %v992_v0  ;;  %820 = vmatprep.subr.bf16.mxu1 %v992_v0 }
  0x31   :  { %801 = vmatpush3.bf16.msra.mxu0 %v918_v13  ;;  %821 = vmatpush3.bf16.msra.mxu1 %v926_v18 }
  0x32   :  { %826 = vmatprep.subr.bf16.mxu0 %v992_v0  ;;  %846 = vmatprep.subr.bf16.mxu1 %v992_v0 }
  0x34   :  { %803 = vmatmul.mubr.bf16.vlgmr.msra.gmra.mrb[0].mxu0 %v27_v16 }
  0x35   :  { %842 = vmatprep.mubr.msk.bf16.mxu0 %vm993_vm0, %v992_v0  ;;  %827 = vmatpush3.bf16.msra.mxu0 %v927_v19 }
  0x36   :  { %828 = vmatprep.subr.bf16.mxu0 %v992_v0 }
  0x39   :  { %829 = vmatpush3.bf16.msra.mxu0 %v928_v20 }
  0x3a   :  { %830 = vmatprep.subr.bf16.mxu0 %v992_v0 }
  0x3d   :  { %831 = vmatpush3.bf16.msra.mxu0 %v929_v21 }
  0x3e   :  { %832 = vmatprep.subr.bf16.mxu0 %v992_v0 }
  0x41   :  { %833 = vmatpush3.bf16.msra.mxu0 %v930_v22 }
  0x42   :  { %834 = vmatprep.subr.bf16.mxu0 %v992_v0 }
  0x45   :  { %835 = vmatpush3.bf16.msra.mxu0 %v931_v23 }
  0x46   :  { %836 = vmatprep.subr.bf16.mxu0 %v992_v0 }
  0x49   :  { %837 = vmatpush3.bf16.msra.mxu0 %v932_v24 }
  0x4a   :  { %838 = vmatprep.subr.bf16.mxu0 %v992_v0 }
  0x4d   :  { %839 = vmatpush3.bf16.msra.mxu0 %v933_v25 }
  0x4e   :  { %840 = vmatprep.subr.bf16.mxu0 %v992_v0 }
  0x51   :  { %841 = vmatpush3.bf16.msra.mxu0 %v934_v32 }
  0x52   :  { %866 = vmatprep.subr.bf16.mxu0 %v992_v0 }
 0x107   :  { %v126_v26 = vpop.f32.mrb[0].mxu0 }
 0x108   :  { %v132_v27 = vmax.f32 %v126_v26, 0.0  ;;  %v804_v28 = vpop.f32.mrb[1].mxu0 }
 0x109   :  { %v129_v29 = vpop.f32.mrb[2].mxu0 }
 0x10a   :  { %v133_v30 = vpack.c.bf16 %v132_v27, %v132_v27  ;;  %v805_v31 = vpop.f32.mrb[3].mxu0 }
 0x10c   :  { %823 = vmatmul.mubr.bf16.vlgmr.msra.gmra.mrb[0].mxu1 %v133_v30 }
 0x10d   :  { %862 = vmatprep.mubr.msk.bf16.mxu1 %vm993_vm0, %v992_v0  ;;  %847 = vmatpush3.bf16.msra.mxu1 %v935_v33 }
 0x10e   :  { %848 = vmatprep.subr.bf16.mxu1 %v992_v0 }
 0x111   :  { %849 = vmatpush3.bf16.msra.mxu1 %v936_v34 }
 0x112   :  { %850 = vmatprep.subr.bf16.mxu1 %v992_v0 }
 0x115   :  { %851 = vmatpush3.bf16.msra.mxu1 %v937_v35 }
 0x116   :  { %852 = vmatprep.subr.bf16.mxu1 %v992_v0 }
 0x119   :  { %853 = vmatpush3.bf16.msra.mxu1 %v938_v42 }
 0x11a   :  { %854 = vmatprep.subr.bf16.mxu1 %v992_v0 }
 0x11d   :  { %855 = vmatpush3.bf16.msra.mxu1 %v939_v43 }
 0x11e   :  { %856 = vmatprep.subr.bf16.mxu1 %v992_v0 }
 0x121   :  { %857 = vmatpush3.bf16.msra.mxu1 %v940_v44 }
 0x122   :  { %858 = vmatprep.subr.bf16.mxu1 %v992_v0 }
 0x125   :  { %859 = vmatpush3.bf16.msra.mxu1 %v941_v45 }
 0x126   :  { %860 = vmatprep.subr.bf16.mxu1 %v992_v0 }
 0x129   :  { %861 = vmatpush3.bf16.msra.mxu1 %v942_v46 }
 0x12a   :  { %886 = vmatprep.subr.bf16.mxu1 %v992_v0 }
 0x1df   :  { %v232_v36 = vpop.f32.mrb[0].mxu1 }
 0x1e0   :  { %v238_v37 = vmax.f32 %v232_v36, 0.0  ;;  %v824_v38 = vpop.f32.mrb[1].mxu1 }
 0x1e1   :  { %v235_v39 = vpop.f32.mrb[2].mxu1 }
 0x1e2   :  { %v239_v40 = vpack.c.bf16 %v238_v37, %v238_v37  ;;  %v825_v41 = vpop.f32.mrb[3].mxu1 }
 0x1e4   :  { %843 = vmatmul.mubr.bf16.vlgmr.msra.gmra.mrb[4].mxu0 %v239_v40 }
 0x1e5   :  { %882 = vmatprep.mubr.msk.bf16.mxu0 %vm993_vm0, %v992_v0  ;;  %867 = vmatpush3.bf16.msra.mxu0 %v943_v47 }
 0x1e6   :  { %868 = vmatprep.subr.bf16.mxu0 %v992_v0 }
 0x1e9   :  { %869 = vmatpush3.bf16.msra.mxu0 %v944_v48 }
 0x1ea   :  { %870 = vmatprep.subr.bf16.mxu0 %v992_v0 }
 0x1ed   :  { %871 = vmatpush3.bf16.msra.mxu0 %v945_v49 }
 0x1ee   :  { %872 = vmatprep.subr.bf16.mxu0 %v992_v0 }
 0x1f1   :  { %873 = vmatpush3.bf16.msra.mxu0 %v946_v50 }
 0x1f2   :  { %874 = vmatprep.subr.bf16.mxu0 %v992_v0 }
 0x1f5   :  { %875 = vmatpush3.bf16.msra.mxu0 %v947_v51 }
 0x1f6   :  { %876 = vmatprep.subr.bf16.mxu0 %v992_v0 }
 0x1f9   :  { %877 = vmatpush3.bf16.msra.mxu0 %v948_v52 }
 0x1fa   :  { %878 = vmatprep.subr.bf16.mxu0 %v992_v0 }
 0x1fd   :  { %879 = vmatpush3.bf16.msra.mxu0 %v949_v53 }
 0x1fe   :  { %880 = vmatprep.subr.bf16.mxu0 %v992_v0 }
 0x201   :  { %881 = vmatpush3.bf16.msra.mxu0 %v950_v3 }
 0x2b7   :  { %v1079_v54 = vpop.f32.mrb[4].mxu0 }
 0x2b8   :  { %v347_v55 = vmul.f32 0.5, %v1079_v54  ;;  %v844_v56 = vpop.f32.mrb[5].mxu0 }
 0x2b9   :  { %v341_v57 = vpop.f32.mrb[6].mxu0 }
 0x2ba   :  { %v348_v58 = vmul.f32 1.442695, %v347_v55  ;;  %v845_v59 = vpop.f32.mrb[7].mxu0 }
 0x2bc   :  { %959 = vpow2.f32 %v348_v58 }
 0x2c6   :  { %v960_v62 = vpop.eup %959 }
 0x2c7   :  { %v350_v63 = vmul.f32 %v960_v62, %v1039_v14 }
 0x2c9   :  { %v351_v1 = vsel %vm346_vm1, %v1079_v54, %v350_v63 }
 0x2ca   :  { %v352_v2 = vpack.c.bf16 %v351_v1, %v351_v1 }
 0x2cc   :  { %863 = vmatmul.mubr.bf16.vlgmr.msra.gmra.mrb[4].mxu1 %v352_v2 }
 0x2cd   :  { %902 = vmatprep.mubr.msk.bf16.mxu1 %vm993_vm0, %v992_v0  ;;  %887 = vmatpush3.bf16.msra.mxu1 %v951_v4 }
 0x2ce   :  { %888 = vmatprep.subr.bf16.mxu1 %v992_v0 }
 0x2d1   :  { %889 = vmatpush3.bf16.msra.mxu1 %v952_v5 }
 0x2d2   :  { %890 = vmatprep.subr.bf16.mxu1 %v992_v0 }
 0x2d5   :  { %891 = vmatpush3.bf16.msra.mxu1 %v953_v6 }
 0x2d6   :  { %892 = vmatprep.subr.bf16.mxu1 %v992_v0 }
 0x2d9   :  { %893 = vmatpush3.bf16.msra.mxu1 %v954_v7 }
 0x2da   :  { %894 = vmatprep.subr.bf16.mxu1 %v992_v0 }
 0x2dd   :  { %895 = vmatpush3.bf16.msra.mxu1 %v955_v8 }
 0x2de   :  { %896 = vmatprep.subr.bf16.mxu1 %v992_v0 }
 0x2e1   :  { %897 = vmatpush3.bf16.msra.mxu1 %v956_v9 }
 0x2e2   :  { %898 = vmatprep.subr.bf16.mxu1 %v992_v0 }
 0x2e5   :  { %899 = vmatpush3.bf16.msra.mxu1 %v957_v10 }
 0x2e6   :  { %900 = vmatprep.subr.bf16.mxu1 %v992_v0 }
 0x2e9   :  { %901 = vmatpush3.bf16.msra.mxu1 %v958_v17 }
 0x39f   :  { %v451_v11 = vpop.f32.mrb[4].mxu1 }
 0x3a0   :  { %v457_v12 = vmax.f32 %v451_v11, 0.0  ;;  %v864_v13 = vpop.f32.mrb[5].mxu1 }
 0x3a1   :  { %v454_v14 = vpop.f32.mrb[6].mxu1 }
 0x3a2   :  { %v458_v15 = vpack.c.bf16 %v457_v12, %v457_v12  ;;  %v865_v16 = vpop.f32.mrb[7].mxu1 }
 0x3a4   :  { %883 = vmatmul.mubr.bf16.vlgmr.msra.gmra.mrb[8].mxu0 %v458_v15 }
 0x477   :  { %v557_v18 = vpop.f32.mrb[8].mxu0 }
 0x478   :  { %v563_v19 = vmax.f32 %v557_v18, 0.0  ;;  %v884_v20 = vpop.f32.mrb[9].mxu0 }
 0x479   :  { %v560_v21 = vpop.f32.mrb[10].mxu0 }
 0x47a   :  { %v564_v22 = vpack.c.bf16 %v563_v19, %v563_v19  ;;  %v885_v23 = vpop.f32.mrb[11].mxu0 }
 0x47c   :  { %903 = vmatmul.mubr.bf16.vlgmr.msra.gmra.mrb[8].mxu1 %v564_v22 }
 0x54f   :  { %v663_v24 = vpop.f32.mrb[8].mxu1 }
 0x550   :  { %v731_v25 = vmul.f32 -1.442695, %v663_v24  ;;  %v904_v26 = vpop.f32.mrb[9].mxu1 }
 0x551   :  { %v666_v0 = vpop.f32.mrb[10].mxu1 }
 0x552   :  { %961 = vpow2.f32 %v731_v25  ;;  %v905_v27 = vpop.f32.mrb[11].mxu1 }
 0x55c   :  { %v962_v28 = vpop.eup %961 }
 0x55d   :  { %v672_v29 = vadd.f32 1.0, %v962_v28 }
 0x55f   :  { %963 = vrcp.f32 %v672_v29 }
 0x569   :  { %v964_v30 = vpop.eup %963 }
 0x56a   :  { %v676_v31 = vsel %vm675_vm2, %v1079_v54, %v964_v30 }
 0x56b   :  { %677 = vst [vmem:[%s1099_s2] sm:$0xff] %v676_v31 }
 0x56c   :  { %682 = vsyncpa [#allocation3], 1 }

</bundles_post_ra>
